<compile_context>
chip_gen: v5e
topology: v5e:2x2
jax: 0.10.0
libtpu: 0.0.40
codegen_flags: <defaults>
</compile_context>

<pallas_src>
import functools

import jax
import jax.numpy as jnp
from jax.experimental import pallas as pl
from jax.experimental.pallas import tpu as pltpu

ENC_DIMS = [28 * 28, 128, 64, 12, 2]
DEC_DIMS = [2, 12, 64, 128, 28 * 28]
LAYER_DIMS = list(zip(ENC_DIMS[:-1] + DEC_DIMS[:-1], ENC_DIMS[1:] + DEC_DIMS[1:]))  # 8 layers

# Activation after each Linear, exactly matching the nn.Sequential:
#   encoder: Lin ReLU Lin ReLU Lin ReLU Lin        (latent -> NO activation)
#   decoder: Lin ReLU Lin ReLU Lin ReLU Lin Tanh
ACTIVATIONS = ("relu", "relu", "relu", "none", "relu", "relu", "relu", "tanh")

LANE = 128
D_IO = 28 * 28  # 784


def _round_up(x, m):
    return (x + m - 1) // m * m


def _cdiv(a, b):
    return (a + b - 1) // b


def _bf16_tanh_ok():
    """bf16 tanh only where the EUP/VPU are bf16-native (v6e / v7x); f32 elsewhere."""
    try:
        kind = jax.devices()[0].device_kind.lower()
    except Exception:
        return False
    return ("v6" in kind) or ("v7" in kind) or ("7x" in kind)


def _choose_tile(B, *, max_tile=1024, min_steps=4):
    """Batch tile: aim for >= min_steps grid steps (2 per v7x TensorCore, pipelined),
    cap at max_tile rows (VMEM headroom on v7x), round to 16 rows (bf16 sublane packing)."""
    Bp = _round_up(B, 16)
    n_steps = max(min_steps, _cdiv(Bp, max_tile))
    tile = _round_up(_cdiv(Bp, n_steps), 16)
    return min(tile, max_tile)


def _autoencoder_kernel(x_ref, *refs, tanh_bf16):
    # refs = (w1, b1, w2, b2, ..., w8, b8, out_ref)
    # x_ref: f32 [tile, 784]; inner layer widths pre-padded to 128 lanes; out_ref: bf16 [tile, 784]
    out_ref = refs[-1]
    wb = refs[:-1]
    n_layers = len(wb) // 2

    h = x_ref[...].astype(jnp.bfloat16)  # cast to bf16 in VMEM (MXU-native), not in HBM
    for li in range(n_layers):
        w = wb[2 * li][...]        # bf16 [in, out_p]
        b = wb[2 * li + 1][...]    # f32  [1, out_p]
        z = jnp.dot(h, w, preferred_element_type=jnp.float32) + b  # MXU, fp32 accumulate
        act = ACTIVATIONS[li]
        if act == "relu":
            h = jnp.maximum(z, 0.0).astype(jnp.bfloat16)
        elif act == "tanh":
            # bf16 tanh halves EUP occupancy on v6e/v7x; output is stored bf16 anyway.
            h = jnp.tanh(z.astype(jnp.bfloat16)) if tanh_bf16 else jnp.tanh(z).astype(jnp.bfloat16)
        else:  # latent: no activation
            h = z.astype(jnp.bfloat16)
    out_ref[...] = h.astype(out_ref.dtype)


def autoencoder_forward(x, packed_params, *, max_tile=1024, min_steps=4, tanh_bf16=None):
    """x: [B, 784] float32 (or bfloat16). packed_params: from pack_params().
    Returns bf16 [B, 784] (consumer stays in bf16; no extra HBM cast pass)."""
    B, D = x.shape
    assert D == D_IO
    if tanh_bf16 is None:
        tanh_bf16 = _bf16_tanh_ok()

    tile = _choose_tile(B, max_tile=max_tile, min_steps=min_steps)
    Bp = _round_up(B, tile)
    # Pad only the batch rows, and only when B is not tile-divisible (zero cost for aligned B).
    x_in = x if Bp == B else jnp.pad(x, ((0, Bp - B), (0, 0)))

    flat = []
    in_specs = [pl.BlockSpec((tile, D), lambda i: (i, 0))]  # batch-tiled input, 784 lanes
    for (W, b) in packed_params:
        flat.append(W)
        flat.append(b)
        # Small, grid-invariant: whole arrays stay VMEM-resident across all grid steps.
        in_specs.append(pl.BlockSpec(W.shape, lambda i: (0, 0)))
        in_specs.append(pl.BlockSpec(b.shape, lambda i: (0, 0)))

    kernel = functools.partial(_autoencoder_kernel, tanh_bf16=tanh_bf16)

    out = pl.pallas_call(
        kernel,
        out_shape=jax.ShapeDtypeStruct((Bp, D), jnp.bfloat16),
        grid_spec=pltpu.PrefetchScalarGridSpec(
            num_scalar_prefetch=0,
            grid=(Bp // tile,),
            in_specs=in_specs,
            out_specs=pl.BlockSpec((tile, D), lambda i: (i, 0)),
        ),
        compiler_params=pltpu.CompilerParams(
            dimension_semantics=("parallel",),      # megacore sharding on v7x when grid > 1
            vmem_limit_bytes=48 * 1024 * 1024,      # headroom for tile=1024 on v6e/v5e
        ),
    )(x_in, *flat)

    return out if Bp == B else out[:B]


def init_params(key):
    """Deterministic init mimicking nn.Linear default: U(-1/sqrt(fan_in), 1/sqrt(fan_in))."""
    params = []
    for (din, dout) in LAYER_DIMS:
        key, kw, kb = jax.random.split(key, 3)
        bound = 1.0 / (din ** 0.5)
        W = jax.random.uniform(kw, (din, dout), jnp.float32, -bound, bound)
        b = jax.random.uniform(kb, (1, dout), jnp.float32, -bound, bound)
        params.append((W, b))
    return params


def pack_params(params):
    """Pad only inner layer widths to 128-lane multiples (2/12/64 -> 128); the 784-wide I/O dims
    of the first/last layers are left unpadded so no zero lanes cross HBM. W -> bf16, b stays f32.
    Zero pads contribute exactly 0 to the fp32 accumulation, so semantics are unchanged."""
    packed = []
    n = len(params)
    for li, (W, b) in enumerate(params):
        din, dout = W.shape
        din_p = din if li == 0 else _round_up(din, LANE)
        dout_p = dout if li == n - 1 else _round_up(dout, LANE)
        Wp = jnp.zeros((din_p, dout_p), jnp.bfloat16).at[:din, :dout].set(W.astype(jnp.bfloat16))
        bp = jnp.zeros((1, dout_p), jnp.float32).at[:, :dout].set(b)
        packed.append((Wp, bp))
    return packed


def reference_forward(x, params):
    """Pure-JAX reference mirroring the kernel's precision (bf16 dots, fp32 accumulate)."""
    h = x.astype(jnp.bfloat16)
    for li, (W, b) in enumerate(params):
        z = jnp.dot(h.astype(jnp.bfloat16), W.astype(jnp.bfloat16),
                    preferred_element_type=jnp.float32) + b
        act = ACTIVATIONS[li]
        if act == "relu":
            h = jnp.maximum(z, 0.0)
        elif act == "tanh":
            h = jnp.tanh(z)
        else:
            h = z
    return h.astype(jnp.bfloat16).astype(jnp.float32)


if __name__ == "__main__":
    key = jax.random.PRNGKey(0)
    key, kx = jax.random.split(key)

    B = 16  # small demo batch; wrapper sizes the tile/grid for arbitrary B
    x = jax.random.normal(kx, (B, 28 * 28), jnp.float32)

    params = init_params(key)
    packed = pack_params(params)

    out = autoencoder_forward(x, packed)
    out = jax.block_until_ready(out)
    assert out.shape == (B, 28 * 28)
    assert out.dtype == jnp.bfloat16

    ref = reference_forward(x, params)
    # bf16 dots / bf16 output (and bf16 tanh on v6e/v7x) => a few-ulp-of-bf16 tolerance.
    assert jnp.allclose(out.astype(jnp.float32), ref, atol=2e-2, rtol=2e-2), \
        "mismatch vs pure-JAX reference"

    print("KERNEL_OK")
</pallas_src>

<mosaic_0001>
module attributes {stable_mosaic.version = 11 : i64} {
  func.func @_autoencoder_kernel(%arg0: i32, %arg1: memref<16x784xf32, #tpu.memory_space<vmem>>, %arg2: memref<784x128xbf16, #tpu.memory_space<vmem>>, %arg3: memref<1x128xf32, #tpu.memory_space<vmem>>, %arg4: memref<128x128xbf16, #tpu.memory_space<vmem>>, %arg5: memref<1x128xf32, #tpu.memory_space<vmem>>, %arg6: memref<128x128xbf16, #tpu.memory_space<vmem>>, %arg7: memref<1x128xf32, #tpu.memory_space<vmem>>, %arg8: memref<128x128xbf16, #tpu.memory_space<vmem>>, %arg9: memref<1x128xf32, #tpu.memory_space<vmem>>, %arg10: memref<128x128xbf16, #tpu.memory_space<vmem>>, %arg11: memref<1x128xf32, #tpu.memory_space<vmem>>, %arg12: memref<128x128xbf16, #tpu.memory_space<vmem>>, %arg13: memref<1x128xf32, #tpu.memory_space<vmem>>, %arg14: memref<128x128xbf16, #tpu.memory_space<vmem>>, %arg15: memref<1x128xf32, #tpu.memory_space<vmem>>, %arg16: memref<128x784xbf16, #tpu.memory_space<vmem>>, %arg17: memref<1x784xf32, #tpu.memory_space<vmem>>, %arg18: memref<16x784xbf16, #tpu.memory_space<vmem>>) attributes {dimension_semantics = [#tpu.dimension_semantics<parallel>], iteration_bounds = array<i64: 1>, scalar_prefetch = 0 : i64, scratch_operands = 0 : i64, tpu.core_type = #tpu.core_type<tc>, window_params = [{transform_indices = @transform_0, window_bounds = array<i64: 16, 784>}, {pipeline_mode = #tpu.pipeline_mode<synchronous>, transform_indices = @transform_1, window_bounds = array<i64: 784, 128>}, {pipeline_mode = #tpu.pipeline_mode<synchronous>, transform_indices = @transform_2, window_bounds = array<i64: 1, 128>}, {pipeline_mode = #tpu.pipeline_mode<synchronous>, transform_indices = @transform_3, window_bounds = array<i64: 128, 128>}, {pipeline_mode = #tpu.pipeline_mode<synchronous>, transform_indices = @transform_4, window_bounds = array<i64: 1, 128>}, {pipeline_mode = #tpu.pipeline_mode<synchronous>, transform_indices = @transform_5, window_bounds = array<i64: 128, 128>}, {pipeline_mode = #tpu.pipeline_mode<synchronous>, transform_indices = @transform_6, window_bounds = array<i64: 1, 128>}, {pipeline_mode = #tpu.pipeline_mode<synchronous>, transform_indices = @transform_7, window_bounds = array<i64: 128, 128>}, {pipeline_mode = #tpu.pipeline_mode<synchronous>, transform_indices = @transform_8, window_bounds = array<i64: 1, 128>}, {pipeline_mode = #tpu.pipeline_mode<synchronous>, transform_indices = @transform_9, window_bounds = array<i64: 128, 128>}, {pipeline_mode = #tpu.pipeline_mode<synchronous>, transform_indices = @transform_10, window_bounds = array<i64: 1, 128>}, {pipeline_mode = #tpu.pipeline_mode<synchronous>, transform_indices = @transform_11, window_bounds = array<i64: 128, 128>}, {pipeline_mode = #tpu.pipeline_mode<synchronous>, transform_indices = @transform_12, window_bounds = array<i64: 1, 128>}, {pipeline_mode = #tpu.pipeline_mode<synchronous>, transform_indices = @transform_13, window_bounds = array<i64: 128, 128>}, {pipeline_mode = #tpu.pipeline_mode<synchronous>, transform_indices = @transform_14, window_bounds = array<i64: 1, 128>}, {pipeline_mode = #tpu.pipeline_mode<synchronous>, transform_indices = @transform_15, window_bounds = array<i64: 128, 784>}, {pipeline_mode = #tpu.pipeline_mode<synchronous>, transform_indices = @transform_16, window_bounds = array<i64: 1, 784>}, {transform_indices = @transform_17, window_bounds = array<i64: 16, 784>}]} {
    %c0 = arith.constant 0 : index
    %c0_0 = arith.constant 0 : index
    %0 = vector.load %arg1[%c0, %c0_0] : memref<16x784xf32, #tpu.memory_space<vmem>>, vector<16x784xf32>
    %1 = arith.truncf %0 : vector<16x784xf32> to vector<16x784xbf16>
    %c0_1 = arith.constant 0 : index
    %c0_2 = arith.constant 0 : index
    %2 = vector.load %arg2[%c0_1, %c0_2] : memref<784x128xbf16, #tpu.memory_space<vmem>>, vector<784x128xbf16>
    %c0_3 = arith.constant 0 : index
    %c0_4 = arith.constant 0 : index
    %3 = vector.load %arg3[%c0_3, %c0_4] : memref<1x128xf32, #tpu.memory_space<vmem>>, vector<1x128xf32>
    %cst = arith.constant dense<0.000000e+00> : vector<16x128xf32>
    %4 = tpu.matmul %1, %2, %cst {dimension_numbers = #tpu.dot_dimension_numbers<[1], [0], [0], [1], [0, 0, 1, 1], [], []>} : vector<16x784xbf16>, vector<784x128xbf16>, vector<16x128xf32> -> vector<16x128xf32>
    %5 = vector.broadcast %3 : vector<1x128xf32> to vector<16x128xf32>
    %6 = arith.addf %4, %5 : vector<16x128xf32>
    %cst_5 = arith.constant 0.000000e+00 : f32
    %7 = vector.broadcast %cst_5 : f32 to vector<16x128xf32>
    %8 = arith.maximumf %6, %7 : vector<16x128xf32>
    %9 = arith.truncf %8 : vector<16x128xf32> to vector<16x128xbf16>
    %c0_6 = arith.constant 0 : index
    %c0_7 = arith.constant 0 : index
    %10 = vector.load %arg4[%c0_6, %c0_7] : memref<128x128xbf16, #tpu.memory_space<vmem>>, vector<128x128xbf16>
    %c0_8 = arith.constant 0 : index
    %c0_9 = arith.constant 0 : index
    %11 = vector.load %arg5[%c0_8, %c0_9] : memref<1x128xf32, #tpu.memory_space<vmem>>, vector<1x128xf32>
    %cst_10 = arith.constant dense<0.000000e+00> : vector<16x128xf32>
    %12 = tpu.matmul %9, %10, %cst_10 {dimension_numbers = #tpu.dot_dimension_numbers<[1], [0], [0], [1], [0, 0, 1, 1], [], []>} : vector<16x128xbf16>, vector<128x128xbf16>, vector<16x128xf32> -> vector<16x128xf32>
    %13 = vector.broadcast %11 : vector<1x128xf32> to vector<16x128xf32>
    %14 = arith.addf %12, %13 : vector<16x128xf32>
    %cst_11 = arith.constant 0.000000e+00 : f32
    %15 = vector.broadcast %cst_11 : f32 to vector<16x128xf32>
    %16 = arith.maximumf %14, %15 : vector<16x128xf32>
    %17 = arith.truncf %16 : vector<16x128xf32> to vector<16x128xbf16>
    %c0_12 = arith.constant 0 : index
    %c0_13 = arith.constant 0 : index
    %18 = vector.load %arg6[%c0_12, %c0_13] : memref<128x128xbf16, #tpu.memory_space<vmem>>, vector<128x128xbf16>
    %c0_14 = arith.constant 0 : index
    %c0_15 = arith.constant 0 : index
    %19 = vector.load %arg7[%c0_14, %c0_15] : memref<1x128xf32, #tpu.memory_space<vmem>>, vector<1x128xf32>
    %cst_16 = arith.constant dense<0.000000e+00> : vector<16x128xf32>
    %20 = tpu.matmul %17, %18, %cst_16 {dimension_numbers = #tpu.dot_dimension_numbers<[1], [0], [0], [1], [0, 0, 1, 1], [], []>} : vector<16x128xbf16>, vector<128x128xbf16>, vector<16x128xf32> -> vector<16x128xf32>
    %21 = vector.broadcast %19 : vector<1x128xf32> to vector<16x128xf32>
    %22 = arith.addf %20, %21 : vector<16x128xf32>
    %cst_17 = arith.constant 0.000000e+00 : f32
    %23 = vector.broadcast %cst_17 : f32 to vector<16x128xf32>
    %24 = arith.maximumf %22, %23 : vector<16x128xf32>
    %25 = arith.truncf %24 : vector<16x128xf32> to vector<16x128xbf16>
    %c0_18 = arith.constant 0 : index
    %c0_19 = arith.constant 0 : index
    %26 = vector.load %arg8[%c0_18, %c0_19] : memref<128x128xbf16, #tpu.memory_space<vmem>>, vector<128x128xbf16>
    %c0_20 = arith.constant 0 : index
    %c0_21 = arith.constant 0 : index
    %27 = vector.load %arg9[%c0_20, %c0_21] : memref<1x128xf32, #tpu.memory_space<vmem>>, vector<1x128xf32>
    %cst_22 = arith.constant dense<0.000000e+00> : vector<16x128xf32>
    %28 = tpu.matmul %25, %26, %cst_22 {dimension_numbers = #tpu.dot_dimension_numbers<[1], [0], [0], [1], [0, 0, 1, 1], [], []>} : vector<16x128xbf16>, vector<128x128xbf16>, vector<16x128xf32> -> vector<16x128xf32>
    %29 = vector.broadcast %27 : vector<1x128xf32> to vector<16x128xf32>
    %30 = arith.addf %28, %29 : vector<16x128xf32>
    %31 = arith.truncf %30 : vector<16x128xf32> to vector<16x128xbf16>
    %c0_23 = arith.constant 0 : index
    %c0_24 = arith.constant 0 : index
    %32 = vector.load %arg10[%c0_23, %c0_24] : memref<128x128xbf16, #tpu.memory_space<vmem>>, vector<128x128xbf16>
    %c0_25 = arith.constant 0 : index
    %c0_26 = arith.constant 0 : index
    %33 = vector.load %arg11[%c0_25, %c0_26] : memref<1x128xf32, #tpu.memory_space<vmem>>, vector<1x128xf32>
    %cst_27 = arith.constant dense<0.000000e+00> : vector<16x128xf32>
    %34 = tpu.matmul %31, %32, %cst_27 {dimension_numbers = #tpu.dot_dimension_numbers<[1], [0], [0], [1], [0, 0, 1, 1], [], []>} : vector<16x128xbf16>, vector<128x128xbf16>, vector<16x128xf32> -> vector<16x128xf32>
    %35 = vector.broadcast %33 : vector<1x128xf32> to vector<16x128xf32>
    %36 = arith.addf %34, %35 : vector<16x128xf32>
    %cst_28 = arith.constant 0.000000e+00 : f32
    %37 = vector.broadcast %cst_28 : f32 to vector<16x128xf32>
    %38 = arith.maximumf %36, %37 : vector<16x128xf32>
    %39 = arith.truncf %38 : vector<16x128xf32> to vector<16x128xbf16>
    %c0_29 = arith.constant 0 : index
    %c0_30 = arith.constant 0 : index
    %40 = vector.load %arg12[%c0_29, %c0_30] : memref<128x128xbf16, #tpu.memory_space<vmem>>, vector<128x128xbf16>
    %c0_31 = arith.constant 0 : index
    %c0_32 = arith.constant 0 : index
    %41 = vector.load %arg13[%c0_31, %c0_32] : memref<1x128xf32, #tpu.memory_space<vmem>>, vector<1x128xf32>
    %cst_33 = arith.constant dense<0.000000e+00> : vector<16x128xf32>
    %42 = tpu.matmul %39, %40, %cst_33 {dimension_numbers = #tpu.dot_dimension_numbers<[1], [0], [0], [1], [0, 0, 1, 1], [], []>} : vector<16x128xbf16>, vector<128x128xbf16>, vector<16x128xf32> -> vector<16x128xf32>
    %43 = vector.broadcast %41 : vector<1x128xf32> to vector<16x128xf32>
    %44 = arith.addf %42, %43 : vector<16x128xf32>
    %cst_34 = arith.constant 0.000000e+00 : f32
    %45 = vector.broadcast %cst_34 : f32 to vector<16x128xf32>
    %46 = arith.maximumf %44, %45 : vector<16x128xf32>
    %47 = arith.truncf %46 : vector<16x128xf32> to vector<16x128xbf16>
    %c0_35 = arith.constant 0 : index
    %c0_36 = arith.constant 0 : index
    %48 = vector.load %arg14[%c0_35, %c0_36] : memref<128x128xbf16, #tpu.memory_space<vmem>>, vector<128x128xbf16>
    %c0_37 = arith.constant 0 : index
    %c0_38 = arith.constant 0 : index
    %49 = vector.load %arg15[%c0_37, %c0_38] : memref<1x128xf32, #tpu.memory_space<vmem>>, vector<1x128xf32>
    %cst_39 = arith.constant dense<0.000000e+00> : vector<16x128xf32>
    %50 = tpu.matmul %47, %48, %cst_39 {dimension_numbers = #tpu.dot_dimension_numbers<[1], [0], [0], [1], [0, 0, 1, 1], [], []>} : vector<16x128xbf16>, vector<128x128xbf16>, vector<16x128xf32> -> vector<16x128xf32>
    %51 = vector.broadcast %49 : vector<1x128xf32> to vector<16x128xf32>
    %52 = arith.addf %50, %51 : vector<16x128xf32>
    %cst_40 = arith.constant 0.000000e+00 : f32
    %53 = vector.broadcast %cst_40 : f32 to vector<16x128xf32>
    %54 = arith.maximumf %52, %53 : vector<16x128xf32>
    %55 = arith.truncf %54 : vector<16x128xf32> to vector<16x128xbf16>
    %c0_41 = arith.constant 0 : index
    %c0_42 = arith.constant 0 : index
    %56 = vector.load %arg16[%c0_41, %c0_42] : memref<128x784xbf16, #tpu.memory_space<vmem>>, vector<128x784xbf16>
    %c0_43 = arith.constant 0 : index
    %c0_44 = arith.constant 0 : index
    %57 = vector.load %arg17[%c0_43, %c0_44] : memref<1x784xf32, #tpu.memory_space<vmem>>, vector<1x784xf32>
    %cst_45 = arith.constant dense<0.000000e+00> : vector<16x784xf32>
    %58 = tpu.matmul %55, %56, %cst_45 {dimension_numbers = #tpu.dot_dimension_numbers<[1], [0], [0], [1], [0, 0, 1, 1], [], []>} : vector<16x128xbf16>, vector<128x784xbf16>, vector<16x784xf32> -> vector<16x784xf32>
    %59 = vector.broadcast %57 : vector<1x784xf32> to vector<16x784xf32>
    %60 = arith.addf %58, %59 : vector<16x784xf32>
    %61 = math.tanh %60 : vector<16x784xf32>
    %62 = arith.truncf %61 : vector<16x784xf32> to vector<16x784xbf16>
    %c0_46 = arith.constant 0 : index
    %c0_47 = arith.constant 0 : index
    %63 = vector.load %arg18[%c0_46, %c0_47] : memref<16x784xbf16, #tpu.memory_space<vmem>>, vector<16x784xbf16>
    tpu.vector_store %arg18[%c0_46, %c0_47], %62 {strides = array<i32>} : memref<16x784xbf16, #tpu.memory_space<vmem>>, vector<16x784xbf16>,
    return
  }
  func.func @transform_0(%arg0: i32) -> (i32, i32) {
    %c0_i32 = arith.constant 0 : i32
    %c0_i32_0 = arith.constant 0 : i32
    return %arg0, %c0_i32 : i32, i32
  }
  func.func @transform_1(%arg0: i32) -> (i32, i32) {
    %c0_i32 = arith.constant 0 : i32
    %c0_i32_0 = arith.constant 0 : i32
    %c0_i32_1 = arith.constant 0 : i32
    return %c0_i32, %c0_i32_0 : i32, i32
  }
  func.func @transform_2(%arg0: i32) -> (i32, i32) {
    %c0_i32 = arith.constant 0 : i32
    %c0_i32_0 = arith.constant 0 : i32
    %c0_i32_1 = arith.constant 0 : i32
    return %c0_i32, %c0_i32_0 : i32, i32
  }
  func.func @transform_3(%arg0: i32) -> (i32, i32) {
    %c0_i32 = arith.constant 0 : i32
    %c0_i32_0 = arith.constant 0 : i32
    %c0_i32_1 = arith.constant 0 : i32
    return %c0_i32, %c0_i32_0 : i32, i32
  }
  func.func @transform_4(%arg0: i32) -> (i32, i32) {
    %c0_i32 = arith.constant 0 : i32
    %c0_i32_0 = arith.constant 0 : i32
    %c0_i32_1 = arith.constant 0 : i32
    return %c0_i32, %c0_i32_0 : i32, i32
  }
  func.func @transform_5(%arg0: i32) -> (i32, i32) {
    %c0_i32 = arith.constant 0 : i32
    %c0_i32_0 = arith.constant 0 : i32
    %c0_i32_1 = arith.constant 0 : i32
    return %c0_i32, %c0_i32_0 : i32, i32
  }
  func.func @transform_6(%arg0: i32) -> (i32, i32) {
    %c0_i32 = arith.constant 0 : i32
    %c0_i32_0 = arith.constant 0 : i32
    %c0_i32_1 = arith.constant 0 : i32
    return %c0_i32, %c0_i32_0 : i32, i32
  }
  func.func @transform_7(%arg0: i32) -> (i32, i32) {
    %c0_i32 = arith.constant 0 : i32
    %c0_i32_0 = arith.constant 0 : i32
    %c0_i32_1 = arith.constant 0 : i32
    return %c0_i32, %c0_i32_0 : i32, i32
  }
  func.func @transform_8(%arg0: i32) -> (i32, i32) {
    %c0_i32 = arith.constant 0 : i32
    %c0_i32_0 = arith.constant 0 : i32
    %c0_i32_1 = arith.constant 0 : i32
    return %c0_i32, %c0_i32_0 : i32, i32
  }
  func.func @transform_9(%arg0: i32) -> (i32, i32) {
    %c0_i32 = arith.constant 0 : i32
    %c0_i32_0 = arith.constant 0 : i32
    %c0_i32_1 = arith.constant 0 : i32
    return %c0_i32, %c0_i32_0 : i32, i32
  }
  func.func @transform_10(%arg0: i32) -> (i32, i32) {
    %c0_i32 = arith.constant 0 : i32
    %c0_i32_0 = arith.constant 0 : i32
    %c0_i32_1 = arith.constant 0 : i32
    return %c0_i32, %c0_i32_0 : i32, i32
  }
  func.func @transform_11(%arg0: i32) -> (i32, i32) {
    %c0_i32 = arith.constant 0 : i32
    %c0_i32_0 = arith.constant 0 : i32
    %c0_i32_1 = arith.constant 0 : i32
    return %c0_i32, %c0_i32_0 : i32, i32
  }
  func.func @transform_12(%arg0: i32) -> (i32, i32) {
    %c0_i32 = arith.constant 0 : i32
    %c0_i32_0 = arith.constant 0 : i32
    %c0_i32_1 = arith.constant 0 : i32
    return %c0_i32, %c0_i32_0 : i32, i32
  }
  func.func @transform_13(%arg0: i32) -> (i32, i32) {
    %c0_i32 = arith.constant 0 : i32
    %c0_i32_0 = arith.constant 0 : i32
    %c0_i32_1 = arith.constant 0 : i32
    return %c0_i32, %c0_i32_0 : i32, i32
  }
  func.func @transform_14(%arg0: i32) -> (i32, i32) {
    %c0_i32 = arith.constant 0 : i32
    %c0_i32_0 = arith.constant 0 : i32
    %c0_i32_1 = arith.constant 0 : i32
    return %c0_i32, %c0_i32_0 : i32, i32
  }
  func.func @transform_15(%arg0: i32) -> (i32, i32) {
    %c0_i32 = arith.constant 0 : i32
    %c0_i32_0 = arith.constant 0 : i32
    %c0_i32_1 = arith.constant 0 : i32
    return %c0_i32, %c0_i32_0 : i32, i32
  }
  func.func @transform_16(%arg0: i32) -> (i32, i32) {
    %c0_i32 = arith.constant 0 : i32
    %c0_i32_0 = arith.constant 0 : i32
    %c0_i32_1 = arith.constant 0 : i32
    return %c0_i32, %c0_i32_0 : i32, i32
  }
  func.func @transform_17(%arg0: i32) -> (i32, i32) {
    %c0_i32 = arith.constant 0 : i32
    %c0_i32_0 = arith.constant 0 : i32
    return %arg0, %c0_i32 : i32, i32
  }
}

</mosaic_0001>

<bundles_post_ra>
// kernel: tpu_custom_call.1
= control target key start
LH: loop header
LB: loop body
LE: loop exit
PB: predicated region body
PF: predicated region fallthrough
CT: control target
= control target key end

     0   :  { %s3261_s0 = inlined_call_operand.vmem [shape: f32[16,784], index: 0, kind: input, shape index: {}]   ;;  %s3262_s1 = inlined_call_operand.vmem [shape: bf16[784,128], index: 1, kind: input, shape index: {}]   ;;  %s3263_s2 = inlined_call_operand.vmem [shape: f32[1,128], index: 2, kind: input, shape index: {}]   ;;  %s3264_s3 = inlined_call_operand.vmem [shape: bf16[128,128], index: 3, kind: input, shape index: {}]   ;;  %s3265_s4 = inlined_call_operand.vmem [shape: f32[1,128], index: 4, kind: input, shape index: {}]   ;;  %s3266_s5 = inlined_call_operand.vmem [shape: bf16[128,128], index: 5, kind: input, shape index: {}]   ;;  %s3267_s6 = inlined_call_operand.vmem [shape: f32[1,128], index: 6, kind: input, shape index: {}]   ;;  %s3268_s7 = inlined_call_operand.vmem [shape: bf16[128,128], index: 7, kind: input, shape index: {}]   ;;  %s3269_s8 = inlined_call_operand.vmem [shape: f32[1,128], index: 8, kind: input, shape index: {}]   ;;  %s3270_s9 = inlined_call_operand.vmem [shape: bf16[128,128], index: 9, kind: input, shape index: {}]   ;;  %s3271_s10 = inlined_call_operand.vmem [shape: f32[1,128], index: 10, kind: input, shape index: {}]   ;;  %s3272_s11 = inlined_call_operand.vmem [shape: bf16[128,128], index: 11, kind: input, shape index: {}]   ;;  %s3273_s12 = inlined_call_operand.vmem [shape: f32[1,128], index: 12, kind: input, shape index: {}]   ;;  %s3274_s13 = inlined_call_operand.hbm [shape: bf16[128,128], index: 13, kind: input, shape index: {}]   ;;  %s3275_s14 = inlined_call_operand.vmem [shape: f32[1,128], index: 14, kind: input, shape index: {}]   ;;  %s3276_s15 = inlined_call_operand.vmem [shape: bf16[128,784], index: 15, kind: input, shape index: {}]   ;;  %s3277_s16 = inlined_call_operand.vmem [shape: f32[1,784], index: 16, kind: input, shape index: {}]   ;;  %s3278_s17 = inlined_call_operand.hbm [shape: bf16[16,784], index: 17, kind: output, shape index: {}]  }
   0x1   :  { %3281 = sst [smem:[#allocation8_spill]] %s3261_s0 }
   0x2   :  { %3282 = sst [smem:[#allocation9_spill]] %s3262_s1 }
   0x3   :  { %22 = vsyncpa [#allocation3], 0 }
   0x4   :  { %23 = vsyncpa [#allocation4], 0  ;;  %s54_s26 = sshll.u32 %s3274_s13, 4  ;;  %s2479_s27 = smov [#allocation2]   ;;  %s55_s26 = int_to_ptr.hbm [resolvable:$true] %s54_s26 }
   0x5   :  { %s56_s28 = sshll.u32 %s2479_s27, 4  ;;  %s2480_s29 = smov 64   ;;  %s57_s28 = int_to_ptr.vmem [resolvable:$true] %s56_s28 }
   0x6   :  { %s2481_s0 = smov 4  }
   0x7   :  { %62 = dma.hbm_to_vmem [thread:$0]  %s55_s26, 1024, %s57_s28, [#allocation3], %s2480_s29, %s2480_s29, %s2481_s0  }
   0x8   :  { %2475 = dma.done.wait [#allocation3], 1024  }
   0x9   :  { %2476 = vsyncadd [#allocation3], 4294966272  ;;  %s3283_s19 = sld [smem:[#allocation9_spill]]  ;;  %vm491_vm0 = vcmask 130048   ;;  %vm1595_vm1 = vcmask 125952   ;;  %s2483_s30 = smov 448  }
   0xa   :  { %s3284_s1 = sld [smem:[#allocation8_spill]] }
   0xf   :  { %v2240_v0 = vld [vmem:[%s3283_s19 + $0x38] sm:$0xff]  ;;  %v2239_v4 = vld [vmem:[%s3283_s19 + $0x30] sm:$0xff]  ;;  %v2238_v8 = vld [vmem:[%s3283_s19 + $0x28] sm:$0xff] }
  0x10   :  { %v2248_v1 = vld [vmem:[%s3283_s19 + $0x78] sm:$0xff]  ;;  %495 = vmatpush.bf16.msra.mxu0 %v2240_v0  ;;  %v2247_v5 = vld [vmem:[%s3283_s19 + $0x70] sm:$0xff]  ;;  %v2246_v9 = vld [vmem:[%s3283_s19 + $0x68] sm:$0xff] }
  0x11   :  { %v2256_v2 = vld [vmem:[%s3283_s19 + $0xb8] sm:$0xff]  ;;  %509 = vmatpush.bf16.msra.mxu1 %v2248_v1  ;;  %v2255_v6 = vld [vmem:[%s3283_s19 + $0xb0] sm:$0xff]  ;;  %v2254_v10 = vld [vmem:[%s3283_s19 + $0xa8] sm:$0xff] }
  0x12   :  { %v2264_v3 = vld [vmem:[%s3283_s19 + $0xf8] sm:$0xff]  ;;  %523 = vmatpush.bf16.msra.mxu2 %v2256_v2  ;;  %v2263_v7 = vld [vmem:[%s3283_s19 + $0xf0] sm:$0xff]  ;;  %v2262_v11 = vld [vmem:[%s3283_s19 + $0xe8] sm:$0xff] }
  0x13   :  { %537 = vmatpush.bf16.msra.mxu3 %v2264_v3  ;;  %v2237_v12 = vld [vmem:[%s3283_s19 + $0x20] sm:$0xff]  ;;  %v2236_v16 = vld [vmem:[%s3283_s19 + $0x18] sm:$0xff]  ;;  %v2235_v20 = vld [vmem:[%s3283_s19 + $0x10] sm:$0xff] }
  0x14   :  { %496 = vmatpush.bf16.msra.mxu0 %v2239_v4  ;;  %v2245_v13 = vld [vmem:[%s3283_s19 + $0x60] sm:$0xff]  ;;  %v2244_v17 = vld [vmem:[%s3283_s19 + $0x58] sm:$0xff]  ;;  %v2243_v21 = vld [vmem:[%s3283_s19 + $0x50] sm:$0xff] }
  0x15   :  { %510 = vmatpush.bf16.msra.mxu1 %v2247_v5  ;;  %v2253_v14 = vld [vmem:[%s3283_s19 + $0xa0] sm:$0xff]  ;;  %v2252_v18 = vld [vmem:[%s3283_s19 + $0x98] sm:$0xff]  ;;  %v2251_v22 = vld [vmem:[%s3283_s19 + $0x90] sm:$0xff] }
  0x16   :  { %524 = vmatpush.bf16.msra.mxu2 %v2255_v6  ;;  %v2261_v15 = vld [vmem:[%s3283_s19 + $0xe0] sm:$0xff]  ;;  %v2260_v19 = vld [vmem:[%s3283_s19 + $0xd8] sm:$0xff]  ;;  %v2259_v23 = vld [vmem:[%s3283_s19 + $0xd0] sm:$0xff] }
  0x17   :  { %538 = vmatpush.bf16.msra.mxu3 %v2263_v7  ;;  %v2234_v24 = vld [vmem:[%s3283_s19 + $0x8] sm:$0xff]  ;;  %v2233_v28 = vld [vmem:[%s3283_s19] sm:$0xff]  ;;  %v81_v31 = vld [vmem:[%s3284_s1 + $0x38] sm:$0xff] }
  0x18   :  { %497 = vmatpush.bf16.msra.mxu0 %v2238_v8  ;;  %v2242_v25 = vld [vmem:[%s3283_s19 + $0x48] sm:$0xff]  ;;  %v2241_v29 = vld [vmem:[%s3283_s19 + $0x40] sm:$0xff]  ;;  %v2272_v34 = vld [vmem:[%s3283_s19 + $0x138] sm:$0xff] }
  0x19   :  { %511 = vmatpush.bf16.msra.mxu1 %v2246_v9  ;;  %v2250_v26 = vld [vmem:[%s3283_s19 + $0x88] sm:$0xff]  ;;  %v74_v30 = vld [vmem:[%s3284_s1] sm:$0xff]  ;;  %v2280_v35 = vld [vmem:[%s3283_s19 + $0x178] sm:$0xff] }
  0x1a   :  { %525 = vmatpush.bf16.msra.mxu2 %v2254_v10  ;;  %v2258_v27 = vld [vmem:[%s3283_s19 + $0xc8] sm:$0xff]  ;;  %v82_v33 = vld [vmem:[%s3284_s1 + $0x40] sm:$0xff]  ;;  %v76_v38 = vld [vmem:[%s3284_s1 + $0x10] sm:$0xff]  ;;  %v88_v40 = vpack.c.bf16 %v81_v31, %v74_v30 }
  0x1b   :  { %539 = vmatpush.bf16.msra.mxu3 %v2262_v11  ;;  %v75_v32 = vld [vmem:[%s3284_s1 + $0x8] sm:$0xff]  ;;  %v2249_v36 = vld [vmem:[%s3283_s19 + $0x80] sm:$0xff]  ;;  %v77_v41 = vld [vmem:[%s3284_s1 + $0x18] sm:$0xff] }
  0x1c   :  { %498 = vmatpush.bf16.msra.mxu0 %v2237_v12  ;;  %v2257_v37 = vld [vmem:[%s3283_s19 + $0xc0] sm:$0xff]  ;;  %v83_v39 = vld [vmem:[%s3284_s1 + $0x48] sm:$0xff]  ;;  %v84_v42 = vld [vmem:[%s3284_s1 + $0x50] sm:$0xff]  ;;  %v89_v43 = vpack.c.bf16 %v82_v33, %v75_v32 }
  0x1d   :  { %512 = vmatpush.bf16.msra.mxu1 %v2245_v13  ;;  %v2281_v44 = vld [vmem:[%s3283_s19 + $0x180] sm:$0xff]  ;;  %v2271_v45 = vld [vmem:[%s3283_s19 + $0x130] sm:$0xff]  ;;  %v90_v47 = vpack.c.bf16 %v83_v39, %v76_v38  ;;  %v91_v48 = vpack.c.bf16 %v84_v42, %v77_v41  ;;  %v2270_v49 = vld [vmem:[%s3283_s19 + $0x128] sm:$0xff] }
  0x1e   :  { %526 = vmatpush.bf16.msra.mxu2 %v2253_v14  ;;  %v2279_v46 = vld [vmem:[%s3283_s19 + $0x170] sm:$0xff]  ;;  %v2278_v50 = vld [vmem:[%s3283_s19 + $0x168] sm:$0xff]  ;;  %v2269_v51 = vld [vmem:[%s3283_s19 + $0x120] sm:$0xff] }
  0x1f   :  { %540 = vmatpush.bf16.msra.mxu3 %v2261_v15  ;;  %v2277_v52 = vld [vmem:[%s3283_s19 + $0x160] sm:$0xff]  ;;  %v2268_v53 = vld [vmem:[%s3283_s19 + $0x118] sm:$0xff]  ;;  %v80_v55 = vld [vmem:[%s3284_s1 + $0x30] sm:$0xff] }
  0x20   :  { %499 = vmatpush.bf16.msra.mxu0 %v2236_v16  ;;  %v2276_v54 = vld [vmem:[%s3283_s19 + $0x158] sm:$0xff]  ;;  %v87_v56 = vld [vmem:[%s3284_s1 + $0x68] sm:$0xff]  ;;  %v2267_v57 = vld [vmem:[%s3283_s19 + $0x110] sm:$0xff] }
  0x21   :  { %513 = vmatpush.bf16.msra.mxu1 %v2244_v17  ;;  %v2275_v58 = vld [vmem:[%s3283_s19 + $0x150] sm:$0xff]  ;;  %v94_v59 = vpack.c.bf16 %v87_v56, %v80_v55  ;;  %v2266_v60 = vld [vmem:[%s3283_s19 + $0x108] sm:$0xff]  ;;  %v2265_v62 = vld [vmem:[%s3283_s19 + $0x100] sm:$0xff] }
  0x22   :  { %527 = vmatpush.bf16.msra.mxu2 %v2252_v18  ;;  %v2274_v61 = vld [vmem:[%s3283_s19 + $0x148] sm:$0xff]  ;;  %v2273_v63 = vld [vmem:[%s3283_s19 + $0x140] sm:$0xff]  ;;  %v85_v1 = vld [vmem:[%s3284_s1 + $0x58] sm:$0xff] }
  0x23   :  { %541 = vmatpush.bf16.msra.mxu3 %v2260_v19  ;;  %v78_v0 = vld [vmem:[%s3284_s1 + $0x20] sm:$0xff]  ;;  %v79_v2 = vld [vmem:[%s3284_s1 + $0x28] sm:$0xff]  ;;  %v2289_v6 = vld [vmem:[%s3264_s3 + $0x38] sm:$0xff] }
  0x24   :  { %500 = vmatpush.bf16.msra.mxu0 %v2235_v20  ;;  %v86_v3 = vld [vmem:[%s3284_s1 + $0x60] sm:$0xff]  ;;  %v92_v4 = vpack.c.bf16 %v85_v1, %v78_v0  ;;  %v2288_v7 = vld [vmem:[%s3264_s3 + $0x30] sm:$0xff]  ;;  %v2287_v8 = vld [vmem:[%s3264_s3 + $0x28] sm:$0xff] }
  0x25   :  { %514 = vmatpush.bf16.msra.mxu1 %v2243_v21  ;;  %v93_v5 = vpack.c.bf16 %v86_v3, %v79_v2  ;;  %v2286_v9 = vld [vmem:[%s3264_s3 + $0x20] sm:$0xff]  ;;  %v2285_v10 = vld [vmem:[%s3264_s3 + $0x18] sm:$0xff]  ;;  %v2284_v11 = vld [vmem:[%s3264_s3 + $0x10] sm:$0xff] }
  0x26   :  { %528 = vmatpush.bf16.msra.mxu2 %v2251_v22  ;;  %v2283_v12 = vld [vmem:[%s3264_s3 + $0x8] sm:$0xff]  ;;  %v2282_v16 = vld [vmem:[%s3264_s3] sm:$0xff]  ;;  %v2297_v18 = vld [vmem:[%s3266_s5 + $0x38] sm:$0xff] }
  0x27   :  { %542 = vmatpush.bf16.msra.mxu3 %v2259_v23  ;;  %v2392_v17 = vld [vmem:[%s3263_s2] ss:$0 sm:$0xff]  ;;  %v2296_v20 = vld [vmem:[%s3266_s5 + $0x30] sm:$0xff]  ;;  %v2303_v56 = vld [vmem:[%s3268_s7 + $0x28] sm:$0xff] }
  0x28   :  { %501 = vmatpush.bf16.msra.mxu0 %v2234_v24  ;;  %v2304_v55 = vld [vmem:[%s3268_s7 + $0x30] sm:$0xff]  ;;  %v2301_v2 = vld [vmem:[%s3268_s7 + $0x18] sm:$0xff] }
  0x29   :  { %515 = vmatpush.bf16.msra.mxu1 %v2242_v25  ;;  %v2295_v25 = vld [vmem:[%s3266_s5 + $0x28] sm:$0xff]  ;;  %v2300_v3 = vld [vmem:[%s3268_s7 + $0x10] sm:$0xff] }
  0x2a   :  { %529 = vmatpush.bf16.msra.mxu2 %v2250_v26 }
  0x2b   :  { %543 = vmatpush.bf16.msra.mxu3 %v2258_v27 }
  0x2c   :  { %502 = vmatpush.bf16.msra.mxu0 %v2233_v28 }
  0x2d   :  { %516 = vmatpush.bf16.msra.mxu1 %v2241_v29  ;;  %v2294_v29 = vld [vmem:[%s3266_s5 + $0x20] sm:$0xff] }
  0x2e   :  { %530 = vmatpush.bf16.msra.mxu2 %v2249_v36 }
  0x2f   :  { %544 = vmatpush.bf16.msra.mxu3 %v2257_v37  ;;  %503 = vmatmul.bf16.vlgmr.msra.gmra.mxu0 %v88_v40 }
  0x30   :  { %551 = vmatpush.bf16.msrb.mxu0 %v2272_v34  ;;  %517 = vmatmul.bf16.vlgmr.msra.gmra.mxu1 %v89_v43 }
  0x31   :  { %565 = vmatpush.bf16.msrb.mxu1 %v2280_v35  ;;  %531 = vmatmul.bf16.vlgmr.msra.gmra.mxu2 %v90_v47 }
  0x32   :  { %586 = vmatpush.bf16.msrb.mxu2 %v2281_v44  ;;  %545 = vmatmul.bf16.vlgmr.msra.gmra.mxu3 %v91_v48 }
  0x33   :  { %664 = vmatpush.bf16.msrb.mxu3 %v2289_v6  ;;  %v2313_v6 = vld [vmem:[%s3270_s9 + $0x38] sm:$0xff] }
  0x34   :  { %552 = vmatpush.bf16.msrb.mxu0 %v2271_v45 }
  0x35   :  { %566 = vmatpush.bf16.msrb.mxu1 %v2279_v46 }
  0x36   :  { %749 = vmatpush.bf16.msra.mxu2 %v2297_v18 }
  0x37   :  { %665 = vmatpush.bf16.msrb.mxu3 %v2288_v7  ;;  %v2312_v7 = vld [vmem:[%s3270_s9 + $0x30] sm:$0xff] }
  0x38   :  { %553 = vmatpush.bf16.msrb.mxu0 %v2270_v49 }
  0x39   :  { %567 = vmatpush.bf16.msrb.mxu1 %v2278_v50  ;;  %v2293_v50 = vld [vmem:[%s3266_s5 + $0x18] sm:$0xff] }
  0x3a   :  { %750 = vmatpush.bf16.msra.mxu2 %v2296_v20  ;;  %v2307_v20 = vld [vmem:[%s3270_s9 + $0x8] sm:$0xff] }
  0x3b   :  { %666 = vmatpush.bf16.msrb.mxu3 %v2287_v8  ;;  %v2311_v8 = vld [vmem:[%s3270_s9 + $0x28] sm:$0xff] }
  0x3c   :  { %554 = vmatpush.bf16.msrb.mxu0 %v2269_v51  ;;  %v2292_v51 = vld [vmem:[%s3266_s5 + $0x10] sm:$0xff] }
  0x3d   :  { %568 = vmatpush.bf16.msrb.mxu1 %v2277_v52  ;;  %v2291_v52 = vld [vmem:[%s3266_s5 + $0x8] sm:$0xff] }
  0x3e   :  { %751 = vmatpush.bf16.msra.mxu2 %v2295_v25  ;;  %v2318_v25 = vld [vmem:[%s3272_s11 + $0x20] sm:$0xff] }
  0x3f   :  { %667 = vmatpush.bf16.msrb.mxu3 %v2286_v9  ;;  %v2310_v9 = vld [vmem:[%s3270_s9 + $0x20] sm:$0xff] }
  0x40   :  { %555 = vmatpush.bf16.msrb.mxu0 %v2268_v53  ;;  %v2290_v53 = vld [vmem:[%s3266_s5] sm:$0xff] }
  0x41   :  { %569 = vmatpush.bf16.msrb.mxu1 %v2276_v54  ;;  %1816 = vmatmul.msk.bf16.vlgmr.msrb.gmra.mxu2 %vm491_vm0, %v94_v59  ;;  %v2305_v54 = vld [vmem:[%s3268_s7 + $0x38] sm:$0xff]  ;;  %v2393_v59 = vld [vmem:[%s3265_s4] ss:$0 sm:$0xff] }
  0x42   :  { %752 = vmatpush.bf16.msra.mxu2 %v2294_v29 }
  0x43   :  { %668 = vmatpush.bf16.msrb.mxu3 %v2285_v10  ;;  %v2309_v10 = vld [vmem:[%s3270_s9 + $0x18] sm:$0xff] }
  0x44   :  { %556 = vmatpush.bf16.msrb.mxu0 %v2267_v57  ;;  %v2302_v57 = vld [vmem:[%s3268_s7 + $0x20] sm:$0xff] }
  0x45   :  { %570 = vmatpush.bf16.msrb.mxu1 %v2275_v58 }
  0x46   :  { %753 = vmatpush.bf16.msra.mxu2 %v2293_v50  ;;  %v2323_v50 = vld [vmem:[#allocation2 + $0x8] sm:$0xff] }
  0x47   :  { %669 = vmatpush.bf16.msrb.mxu3 %v2284_v11 }
  0x48   :  { %557 = vmatpush.bf16.msrb.mxu0 %v2266_v60 }
  0x49   :  { %571 = vmatpush.bf16.msrb.mxu1 %v2274_v61 }
  0x4a   :  { %754 = vmatpush.bf16.msra.mxu2 %v2292_v51  ;;  %v2322_v51 = vld [vmem:[#allocation2] sm:$0xff] }
  0x4b   :  { %670 = vmatpush.bf16.msrb.mxu3 %v2283_v12  ;;  %v2394_v12 = vld [vmem:[%s3267_s6] ss:$0 sm:$0xff] }
  0x4c   :  { %558 = vmatpush.bf16.msrb.mxu0 %v2265_v62 }
  0x4d   :  { %572 = vmatpush.bf16.msrb.mxu1 %v2273_v63 }
  0x4e   :  { %755 = vmatpush.bf16.msra.mxu2 %v2291_v52  ;;  %v2207_v52 = vld [vmem:[%s3276_s15 + $0x188] sm:$0xf] }
  0x4f   :  { %559 = vmatmul.bf16.vlgmr.msrb.gmra.mxu0 %v92_v4  ;;  %671 = vmatpush.bf16.msrb.mxu3 %v2282_v16  ;;  %v2299_v4 = vld [vmem:[%s3268_s7 + $0x8] sm:$0xff] }
  0x50   :  { %573 = vmatmul.bf16.vlgmr.msrb.gmra.mxu1 %v93_v5  ;;  %834 = vmatpush.bf16.msra.mxu0 %v2305_v54  ;;  %v2298_v5 = vld [vmem:[%s3268_s7] sm:$0xff]  ;;  %v2379_v54 = vld [vmem:[%s3276_s15 + $0x18c] sm:$0xf]  ;;  %s2484_s7 = smov 28  }
  0x51   :  { %917 = vmatpush.bf16.msra.mxu1 %v2313_v6  ;;  %v2151_v6 = vld [vmem:[%s3276_s15 + $0x118] sm:$0xf] }
  0x52   :  { %756 = vmatpush.bf16.msra.mxu2 %v2290_v53  ;;  %v2382_v53 = vld [vmem:[%s3276_s15 + $0x1a0] sm:$0xf0] }
  0x54   :  { %835 = vmatpush.bf16.msra.mxu0 %v2304_v55  ;;  %v2208_v55 = vor.u32 %v2382_v53, %v2207_v52 }
  0x55   :  { %918 = vmatpush.bf16.msra.mxu1 %v2312_v7  ;;  %v2368_v7 = vld [vmem:[%s3276_s15 + $0x130] sm:$0xf0] }
  0x58   :  { %836 = vmatpush.bf16.msra.mxu0 %v2303_v56  ;;  %v2209_v56 = vld [vmem:[%s3276_s15 + $0x1a4] sm:$0xf0] }
  0x59   :  { %919 = vmatpush.bf16.msra.mxu1 %v2311_v8  ;;  %v2365_v8 = vld [vmem:[%s3276_s15 + $0x11c] sm:$0xf] }
  0x5c   :  { %837 = vmatpush.bf16.msra.mxu0 %v2302_v57  ;;  %v2215_v57 = vld [vmem:[%s3276_s15 + $0x190] sm:$0xf] }
  0x5d   :  { %920 = vmatpush.bf16.msra.mxu1 %v2310_v9  ;;  %v2153_v9 = vld [vmem:[%s3276_s15 + $0x134] sm:$0xf0] }
  0x60   :  { %838 = vmatpush.bf16.msra.mxu0 %v2301_v2  ;;  %v2187_v2 = vld [vmem:[%s3276_s15 + $0x158] sm:$0xf] }
  0x61   :  { %921 = vmatpush.bf16.msra.mxu1 %v2309_v10  ;;  %v2159_v10 = vld [vmem:[%s3276_s15 + $0x120] sm:$0xf] }
  0x64   :  { %839 = vmatpush.bf16.msra.mxu0 %v2300_v3  ;;  %v2376_v3 = vld [vmem:[%s3276_s15 + $0x170] sm:$0xf0] }
  0x68   :  { %840 = vmatpush.bf16.msra.mxu0 %v2299_v4 }
  0x6c   :  { %841 = vmatpush.bf16.msra.mxu0 %v2298_v5  ;;  %v2188_v5 = vor.u32 %v2376_v3, %v2187_v2  ;;  %v2011_v2 = vld [vmem:[%s3276_s15] sm:$0xf]  ;;  %v2333_v3 = vld [vmem:[%s3276_s15 + $0x18] sm:$0xf0] }
  0x70   :  { %1472 = vmatpush.bf16.msrb.mxu0 %v2208_v55 }
  0xac   :  { %v504_v13 = vpop.f32.mrf.mxu0 }
  0xad   :  { %v518_v14 = vpop.f32.mrf.mxu1  ;;  %v505_v19 = vadd.f32 %v2392_v17, %v504_v13 }
  0xaf   :  { %v519_v24 = vadd.f32 %v518_v14, %v505_v19  ;;  %v2308_v19 = vld [vmem:[%s3270_s9 + $0x10] sm:$0xff] }
  0xb0   :  { %922 = vmatpush.bf16.msra.mxu1 %v2308_v19  ;;  %v2217_v19 = vld [vmem:[%s3276_s15 + $0x1ac] sm:$0xf0] }
  0xb4   :  { %v532_v15 = vpop.f32.mrf.mxu2  ;;  %v506_v21 = vpop.f32.mrf.mxu0  ;;  %923 = vmatpush.bf16.msra.mxu1 %v2307_v20  ;;  %v2125_v20 = vld [vmem:[%s3276_s15 + $0xfc] sm:$0xf0] }
  0xb5   :  { %v520_v22 = vpop.f32.mrf.mxu1  ;;  %v546_v26 = vpop.f32.mrf.mxu3  ;;  %v507_v27 = vadd.f32 %v2392_v17, %v506_v21  ;;  %v533_v28 = vadd.f32 %v532_v15, %v519_v24  ;;  %v2306_v21 = vld [vmem:[%s3270_s9] sm:$0xff]  ;;  %v2319_v24 = vld [vmem:[%s3272_s11 + $0x28] sm:$0xff] }
  0xb7   :  { %v521_v30 = vadd.f32 %v520_v22, %v507_v27  ;;  %v547_v33 = vadd.f32 %v546_v26, %v533_v28  ;;  %v2321_v22 = vld [vmem:[%s3272_s11 + $0x38] sm:$0xff]  ;;  %v2395_v27 = vld [vmem:[%s3269_s8] ss:$0 sm:$0xff] }
  0xb8   :  { %924 = vmatpush.bf16.msra.mxu1 %v2306_v21  ;;  %1002 = vmatpush.bf16.msra.mxu3 %v2321_v22  ;;  %v2131_v21 = vld [vmem:[%s3276_s15 + $0xe8] sm:$0xf]  ;;  %v2362_v22 = vld [vmem:[%s3276_s15 + $0x100] sm:$0xf0] }
  0xbc   :  { %v534_v23 = vpop.f32.mrf.mxu2 }
  0xbd   :  { %v535_v35 = vadd.f32 %v534_v23, %v521_v30  ;;  %v548_v37 = vpop.f32.mrf.mxu3  ;;  %v2320_v23 = vld [vmem:[%s3272_s11 + $0x30] sm:$0xff] }
  0xbe   :  { %1003 = vmatpush.bf16.msra.mxu3 %v2320_v23 }
  0xbf   :  { %v549_v38 = vadd.f32 %v548_v37, %v535_v35  ;;  %v2314_v35 = vld [vmem:[%s3272_s11] sm:$0xff]  ;;  %v2328_v37 = vld [vmem:[#allocation2 + $0x30] sm:$0xff] }
  0xc2   :  { %1004 = vmatpush.bf16.msra.mxu3 %v2319_v24  ;;  %v2373_v24 = vld [vmem:[%s3276_s15 + $0x15c] sm:$0xf] }
  0xc4   :  { %v588_v34 = vpop.f32.mrf.mxu2 }
  0xc6   :  { %1005 = vmatpush.bf16.msra.mxu3 %v2318_v25 }
  0xcc   :  { %v560_v31 = vpop.f32.mrf.mxu0  ;;  %v590_v45 = vpop.f32.mrf.mxu2 }
  0xcd   :  { %v574_v32 = vpop.f32.mrf.mxu1  ;;  %v561_v36 = vadd.f32 %v560_v31, %v547_v33  ;;  %v2316_v33 = vld [vmem:[%s3272_s11 + $0x10] sm:$0xff] }
  0xcf   :  { %v575_v39 = vadd.f32 %v574_v32, %v561_v36  ;;  %v2317_v32 = vld [vmem:[%s3272_s11 + $0x18] sm:$0xff] }
  0xd0   :  { %1006 = vmatpush.bf16.msra.mxu3 %v2317_v32  ;;  %v2329_v36 = vld [vmem:[#allocation2 + $0x38] sm:$0xff]  ;;  %v2097_v32 = vld [vmem:[%s3276_s15 + $0xc4] sm:$0xf0] }
  0xd1   :  { %v589_v43 = vadd.f32 %v588_v34, %v575_v39  ;;  %v2315_v34 = vld [vmem:[%s3272_s11 + $0x8] sm:$0xff]  ;;  %1087 = vmatpush.bf16.msrb.mxu2 %v2329_v36  ;;  %v2326_v39 = vld [vmem:[#allocation2 + $0x20] sm:$0xff] }
  0xd2   :  { %v2366_v36 = vld [vmem:[%s3276_s15 + $0x124] sm:$0xf] }
  0xd3   :  { %v593_v47 = vmax.f32 %v589_v43, 0.0 }
  0xd4   :  { %v562_v40 = vpop.f32.mrf.mxu0  ;;  %1007 = vmatpush.bf16.msra.mxu3 %v2316_v33  ;;  %v2103_v33 = vld [vmem:[%s3276_s15 + $0xb0] sm:$0xf] }
  0xd5   :  { %v563_v41 = vadd.f32 %v562_v40, %v549_v38  ;;  %v576_v42 = vpop.f32.mrf.mxu1  ;;  %1088 = vmatpush.bf16.msrb.mxu2 %v2328_v37  ;;  %v2327_v38 = vld [vmem:[#allocation2 + $0x28] sm:$0xff]  ;;  %v2161_v37 = vld [vmem:[%s3276_s15 + $0x13c] sm:$0xf0] }
  0xd7   :  { %v577_v44 = vadd.f32 %v576_v42, %v563_v41  ;;  %v2396_v41 = vld [vmem:[%s3271_s10] ss:$0 sm:$0xff] }
  0xd8   :  { %1008 = vmatpush.bf16.msra.mxu3 %v2315_v34 }
  0xd9   :  { %v591_v46 = vadd.f32 %v590_v45, %v577_v44  ;;  %1089 = vmatpush.bf16.msrb.mxu2 %v2327_v38 }
  0xdb   :  { %v594_v48 = vmax.f32 %v591_v46, 0.0 }
  0xdc   :  { %1009 = vmatpush.bf16.msra.mxu3 %v2314_v35  ;;  %v2355_v35 = vld [vmem:[%s3276_s15 + $0xc8] sm:$0xf0] }
  0xdd   :  { %v595_v49 = vpack.c.bf16 %v594_v48, %v593_v47  ;;  %1090 = vmatpush.bf16.msrb.mxu2 %v2326_v39  ;;  %v2325_v48 = vld [vmem:[#allocation2 + $0x18] sm:$0xff]  ;;  %v2067_v39 = vld [vmem:[%s3276_s15 + $0x70] sm:$0xf] }
  0xdf   :  { %672 = vmatmul.bf16.vlgmr.msrb.gmra.mxu3 %v595_v49  ;;  %v2324_v49 = vld [vmem:[#allocation2 + $0x10] sm:$0xff] }
  0xe1   :  { %1091 = vmatpush.bf16.msrb.mxu2 %v2325_v48  ;;  %v2069_v48 = vld [vmem:[%s3276_s15 + $0x8c] sm:$0xf0] }
  0xe5   :  { %1092 = vmatpush.bf16.msrb.mxu2 %v2324_v49  ;;  %v2075_v49 = vld [vmem:[%s3276_s15 + $0x78] sm:$0xf] }
  0xe9   :  { %1093 = vmatpush.bf16.msrb.mxu2 %v2323_v50  ;;  %v2348_v50 = vld [vmem:[%s3276_s15 + $0x90] sm:$0xf0] }
  0xea   :  { %v2076_v55 = vor.u32 %v2348_v50, %v2075_v49  ;;  %v2175_v49 = vld [vmem:[%s3276_s15 + $0x130] sm:$0xf]  ;;  %v2371_v50 = vld [vmem:[%s3276_s15 + $0x148] sm:$0xf0] }
  0xed   :  { %1094 = vmatpush.bf16.msrb.mxu2 %v2322_v51  ;;  %v2397_v51 = vld [vmem:[%s3273_s12] ss:$0 sm:$0xff]  ;;  %s1607_s12 = sshll.u32 %s3278_s17, 4  ;;  %s1608_s12 = int_to_ptr.hbm [resolvable:$true] %s1607_s12 }
 0x162   :  { %v673_v58 = vpop.f32.mrf.mxu3 }
 0x163   :  { %v674_v60 = vadd.f32 %v2393_v59, %v673_v58  ;;  %v2383_v58 = vld [vmem:[%s3276_s15 + $0x1a8] sm:$0xf0] }
 0x165   :  { %v678_v63 = vmax.f32 %v674_v60, 0.0  ;;  %v2216_v60 = vor.u32 %v2383_v58, %v2215_v57  ;;  %v2340_v57 = vld [vmem:[%s3276_s15 + $0x50] sm:$0xf0]  ;;  %v2337_v58 = vld [vmem:[%s3276_s15 + $0x3c] sm:$0xf] }
 0x167   :  { %1500 = vmatpush.bf16.msrb.mxu3 %v2216_v60  ;;  %v2047_v60 = vld [vmem:[%s3276_s15 + $0x40] sm:$0xf] }
 0x16a   :  { %v675_v61 = vpop.f32.mrf.mxu3 }
 0x16b   :  { %v676_v62 = vadd.f32 %v2393_v59, %v675_v61  ;;  %v2212_v59 = vor.u32 %v2379_v54, %v2209_v56  ;;  %v2179_v61 = vld [vmem:[%s3276_s15 + $0x150] sm:$0xf]  ;;  %1501 = vmatpush.bf16.msrb.mxu3 %v2188_v5  ;;  %v2039_v56 = vld [vmem:[%s3276_s15 + $0x38] sm:$0xf]  ;;  %v2330_v5 = vld [vmem:[%s3276_s15 + $0x4] sm:$0xf] }
 0x16d   :  { %v679_v0 = vmax.f32 %v676_v62, 0.0  ;;  %v2375_v62 = vld [vmem:[%s3276_s15 + $0x168] sm:$0xf0]  ;;  %1486 = vmatpush.bf16.msrb.mxu1 %v2212_v59  ;;  %v2041_v59 = vld [vmem:[%s3276_s15 + $0x54] sm:$0xf0] }
 0x16f   :  { %v680_v1 = vpack.c.bf16 %v679_v0, %v678_v63  ;;  %v2372_v63 = vld [vmem:[%s3276_s15 + $0x154] sm:$0xf]  ;;  %v2180_v0 = vor.u32 %v2375_v62, %v2179_v61  ;;  %v2341_v61 = vld [vmem:[%s3276_s15 + $0x58] sm:$0xf0]  ;;  %v2040_v62 = vor.u32 %v2340_v57, %v2039_v56  ;;  %v2363_v56 = vld [vmem:[%s3276_s15 + $0x108] sm:$0xf0] }
 0x170   :  { %v2360_v57 = vld [vmem:[%s3276_s15 + $0xf4] sm:$0xf] }
 0x171   :  { %757 = vmatmul.bf16.vlgmr.msra.gmra.mxu2 %v680_v1  ;;  %v2181_v1 = vld [vmem:[%s3276_s15 + $0x16c] sm:$0xf0]  ;;  %1473 = vmatpush.bf16.msrb.mxu0 %v2180_v0  ;;  %v2044_v0 = vor.u32 %v2337_v58, %v2041_v59 }
 0x172   :  { %v2184_v4 = vor.u32 %v2372_v63, %v2181_v1  ;;  %v2048_v1 = vor.u32 %v2341_v61, %v2047_v60  ;;  %v2141_v58 = vld [vmem:[%s3276_s15 + $0x10c] sm:$0xf0]  ;;  %v2147_v61 = vld [vmem:[%s3276_s15 + $0xf8] sm:$0xf] }
 0x173   :  { %v2144_v60 = vor.u32 %v2360_v57, %v2141_v58 }
 0x174   :  { %1487 = vmatpush.bf16.msrb.mxu1 %v2184_v4 }
 0x1f4   :  { %v758_v11 = vpop.f32.mrf.mxu2 }
 0x1f5   :  { %v759_v13 = vadd.f32 %v2394_v12, %v758_v11  ;;  %v2369_v11 = vld [vmem:[%s3276_s15 + $0x138] sm:$0xf0] }
 0x1f7   :  { %v763_v16 = vmax.f32 %v759_v13, 0.0  ;;  %v2123_v13 = vld [vmem:[%s3276_s15 + $0xe0] sm:$0xf] }
 0x1fc   :  { %v760_v14 = vpop.f32.mrf.mxu2 }
 0x1fd   :  { %v761_v15 = vadd.f32 %v2394_v12, %v760_v14  ;;  %v2152_v12 = vor.u32 %v2368_v7, %v2151_v6  ;;  %v2361_v14 = vld [vmem:[%s3276_s15 + $0xf8] sm:$0xf0]  ;;  %v2013_v6 = vld [vmem:[%s3276_s15 + $0x1c] sm:$0xf0] }
 0x1fe   :  { %v2124_v25 = vor.u32 %v2361_v14, %v2123_v13  ;;  %v2016_v13 = vor.u32 %v2330_v5, %v2013_v6  ;;  %v2119_v5 = vld [vmem:[%s3276_s15 + $0xc0] sm:$0xf]  ;;  %v2357_v6 = vld [vmem:[%s3276_s15 + $0xd8] sm:$0xf0] }
 0x1ff   :  { %v764_v17 = vmax.f32 %v761_v15, 0.0  ;;  %v2156_v15 = vor.u32 %v2365_v8, %v2153_v9  ;;  %1474 = vmatpush.bf16.msrb.mxu0 %v2152_v12  ;;  %v2019_v8 = vld [vmem:[%s3276_s15 + $0x8] sm:$0xf]  ;;  %v2334_v9 = vld [vmem:[%s3276_s15 + $0x20] sm:$0xf0] }
 0x200   :  { %v2020_v14 = vor.u32 %v2334_v9, %v2019_v8  ;;  %v2120_v8 = vor.u32 %v2357_v6, %v2119_v5  ;;  %v2083_v9 = vld [vmem:[%s3276_s15 + $0x80] sm:$0xf] }
 0x201   :  { %v765_v18 = vpack.c.bf16 %v764_v17, %v763_v16  ;;  %v2160_v16 = vor.u32 %v2369_v11, %v2159_v10  ;;  %v2358_v17 = vld [vmem:[%s3276_s15 + $0xe4] sm:$0xf]  ;;  %1488 = vmatpush.bf16.msrb.mxu1 %v2156_v15  ;;  %v2012_v10 = vor.u32 %v2333_v3, %v2011_v2  ;;  %v2353_v2 = vld [vmem:[%s3276_s15 + $0xbc] sm:$0xf] }
 0x203   :  { %842 = vmatmul.bf16.vlgmr.msra.gmra.mxu0 %v765_v18  ;;  %v2380_v18 = vld [vmem:[%s3276_s15 + $0x194] sm:$0xf]  ;;  %1502 = vmatpush.bf16.msrb.mxu3 %v2160_v16 }
 0x204   :  { %v2220_v23 = vor.u32 %v2380_v18, %v2217_v19  ;;  %1475 = vmatpush.bf16.msrb.mxu0 %v2124_v25  ;;  %v2352_v16 = vld [vmem:[%s3276_s15 + $0xb4] sm:$0xf]  ;;  %v2223_v18 = vld [vmem:[%s3276_s15 + $0x198] sm:$0xf]  ;;  %v2231_v25 = vld [vmem:[%s3276_s15 + $0x1a0] sm:$0xf] }
 0x206   :  { %1514 = vmatpush.bf16.msra.mxu2 %v2220_v23 }
 0x280   :  { %v843_v26 = vpop.f32.mrf.mxu0 }
 0x281   :  { %v844_v29 = vadd.f32 %v2395_v27, %v843_v26  ;;  %v2095_v26 = vld [vmem:[%s3276_s15 + $0xa8] sm:$0xf] }
 0x288   :  { %v845_v28 = vpop.f32.mrf.mxu0 }
 0x289   :  { %v846_v30 = vadd.f32 %v2395_v27, %v845_v28  ;;  %v2354_v27 = vld [vmem:[%s3276_s15 + $0xc0] sm:$0xf0]  ;;  %v2189_v28 = vld [vmem:[%s3276_s15 + $0x174] sm:$0xf0] }
 0x28a   :  { %v2192_v34 = vor.u32 %v2373_v24, %v2189_v28  ;;  %v2096_v38 = vor.u32 %v2354_v27, %v2095_v26  ;;  %v2385_v26 = vld [vmem:[%s3276_s15 + $0x1b8] sm:$0xf0] }
 0x28b   :  { %v848_v31 = vpack.c.bf16 %v846_v30, %v844_v29  ;;  %v2128_v29 = vor.u32 %v2358_v17, %v2125_v20  ;;  %v2132_v30 = vor.u32 %v2362_v22, %v2131_v21  ;;  %v2105_v17 = vld [vmem:[%s3276_s15 + $0xcc] sm:$0xf0]  ;;  %v2384_v20 = vld [vmem:[%s3276_s15 + $0x1b0] sm:$0xf0]  ;;  %v2381_v21 = vld [vmem:[%s3276_s15 + $0x19c] sm:$0xf]  ;;  %v2232_v27 = vor.u32 %v2385_v26, %v2231_v25 }
 0x28c   :  { %1515 = vmatpush.bf16.msra.mxu2 %v2192_v34  ;;  %1476 = vmatpush.bf16.msrb.mxu0 %v2096_v38  ;;  %v2108_v19 = vor.u32 %v2352_v16, %v2105_v17  ;;  %v2225_v22 = vld [vmem:[%s3276_s15 + $0x1b4] sm:$0xf0]  ;;  %v2224_v23 = vor.u32 %v2384_v20, %v2223_v18  ;;  %v2345_v28 = vld [vmem:[%s3276_s15 + $0x7c] sm:$0xf]  ;;  %v2197_v34 = vld [vmem:[%s3276_s15 + $0x17c] sm:$0xf0] }
 0x28d   :  { %925 = vmatmul.bf16.vlgmr.msra.gmra.mxu1 %v848_v31  ;;  %v2351_v31 = vld [vmem:[%s3276_s15 + $0xac] sm:$0xf]  ;;  %1503 = vmatpush.bf16.msrb.mxu3 %v2132_v30  ;;  %v2228_v24 = vor.u32 %v2381_v21, %v2225_v22  ;;  %v2195_v30 = vld [vmem:[%s3276_s15 + $0x160] sm:$0xf]  ;;  %v2378_v38 = vld [vmem:[%s3276_s15 + $0x180] sm:$0xf0] }
 0x28e   :  { %1489 = vmatpush.bf16.msrb.mxu1 %v2128_v29  ;;  %v2077_v29 = vld [vmem:[%s3276_s15 + $0x94] sm:$0xf0]  ;;  %v2055_v18 = vld [vmem:[%s3276_s15 + $0x48] sm:$0xf]  ;;  %v2339_v20 = vld [vmem:[%s3276_s15 + $0x4c] sm:$0xf] }
 0x28f   :  { %v2057_v21 = vld [vmem:[%s3276_s15 + $0x64] sm:$0xf0]  ;;  %v2063_v22 = vld [vmem:[%s3276_s15 + $0x50] sm:$0xf] }
 0x290   :  { %v2060_v25 = vor.u32 %v2339_v20, %v2057_v21 }
 0x30a   :  { %v926_v40 = vpop.f32.mrf.mxu1 }
 0x30b   :  { %v927_v42 = vadd.f32 %v2396_v41, %v926_v40  ;;  %v2347_v40 = vld [vmem:[%s3276_s15 + $0x88] sm:$0xf0] }
 0x30c   :  { %v2068_v52 = vor.u32 %v2347_v40, %v2067_v39  ;;  %v2338_v40 = vld [vmem:[%s3276_s15 + $0x44] sm:$0xf] }
 0x30d   :  { %v931_v45 = vmax.f32 %v927_v42, 0.0  ;;  %v2100_v42 = vor.u32 %v2351_v31, %v2097_v32  ;;  %v2080_v31 = vor.u32 %v2345_v28, %v2077_v29  ;;  %v2377_v32 = vld [vmem:[%s3276_s15 + $0x178] sm:$0xf0]  ;;  %v2335_v28 = vld [vmem:[%s3276_s15 + $0x28] sm:$0xf0] }
 0x30e   :  { %1477 = vmatpush.bf16.msrb.mxu0 %v2068_v52  ;;  %v2331_v52 = vld [vmem:[%s3276_s15 + $0xc] sm:$0xf]  ;;  %v2332_v29 = vld [vmem:[%s3276_s15 + $0x14] sm:$0xf] }
 0x30f   :  { %1490 = vmatpush.bf16.msrb.mxu1 %v2100_v42  ;;  %v2167_v42 = vld [vmem:[%s3276_s15 + $0x128] sm:$0xf] }
 0x312   :  { %v928_v43 = vpop.f32.mrf.mxu1  ;;  %1478 = vmatpush.bf16.msrb.mxu0 %v2040_v62  ;;  %v2364_v62 = vld [vmem:[%s3276_s15 + $0x110] sm:$0xf0] }
 0x313   :  { %v929_v44 = vadd.f32 %v2396_v41, %v928_v43  ;;  %v2164_v41 = vor.u32 %v2366_v36, %v2161_v37  ;;  %v2104_v43 = vor.u32 %v2355_v35, %v2103_v33  ;;  %v2374_v33 = vld [vmem:[%s3276_s15 + $0x164] sm:$0xf]  ;;  %v2196_v35 = vor.u32 %v2377_v32, %v2195_v30  ;;  %v2203_v37 = vld [vmem:[%s3276_s15 + $0x168] sm:$0xf]  ;;  %v2029_v30 = vld [vmem:[%s3276_s15 + $0x2c] sm:$0xf0] }
 0x314   :  { %v2200_v36 = vor.u32 %v2374_v33, %v2197_v34  ;;  %v2204_v39 = vor.u32 %v2378_v38, %v2203_v37  ;;  %v2336_v32 = vld [vmem:[%s3276_s15 + $0x30] sm:$0xf0]  ;;  %v2032_v34 = vor.u32 %v2332_v29, %v2029_v30  ;;  %v2398_v37 = vld [vmem:[%s3275_s14] ss:$0 sm:$0xff]  ;;  %s2482_s14 = smov [#allocation5]  }
 0x315   :  { %v932_v46 = vmax.f32 %v929_v44, 0.0  ;;  %v2344_v44 = vld [vmem:[%s3276_s15 + $0x74] sm:$0xf]  ;;  %1516 = vmatpush.bf16.msra.mxu2 %v2164_v41  ;;  %1504 = vmatpush.bf16.msrb.mxu3 %v2104_v43  ;;  %v2049_v41 = vld [vmem:[%s3276_s15 + $0x5c] sm:$0xf0] }
 0x316   :  { %v2072_v54 = vor.u32 %v2344_v44, %v2069_v48  ;;  %1479 = vmatpush.bf16.msrb.mxu0 %v2012_v10  ;;  %v2052_v43 = vor.u32 %v2338_v40, %v2049_v41  ;;  %v2370_v44 = vld [vmem:[%s3276_s15 + $0x140] sm:$0xf0]  ;;  %v2349_v10 = vld [vmem:[%s3276_s15 + $0x98] sm:$0xf0] }
 0x317   :  { %v933_v47 = vpack.c.bf16 %v932_v46, %v931_v45  ;;  %v2359_v45 = vld [vmem:[%s3276_s15 + $0xec] sm:$0xf]  ;;  %v2133_v46 = vld [vmem:[%s3276_s15 + $0x104] sm:$0xf0] }
 0x318   :  { %v2136_v53 = vor.u32 %v2359_v45, %v2133_v46  ;;  %1491 = vmatpush.bf16.msrb.mxu1 %v2072_v54  ;;  %v2367_v45 = vld [vmem:[%s3276_s15 + $0x12c] sm:$0xf]  ;;  %v2169_v46 = vld [vmem:[%s3276_s15 + $0x144] sm:$0xf0]  ;;  %v2139_v54 = vld [vmem:[%s3276_s15 + $0xf0] sm:$0xf] }
 0x319   :  { %1010 = vmatmul.bf16.vlgmr.msra.gmra.mxu3 %v933_v47  ;;  %v2172_v48 = vor.u32 %v2367_v45, %v2169_v46  ;;  %v2140_v59 = vor.u32 %v2363_v56, %v2139_v54 }
 0x31a   :  { %1517 = vmatpush.bf16.msra.mxu2 %v2136_v53  ;;  %1505 = vmatpush.bf16.msrb.mxu3 %v2076_v55  ;;  %v2021_v53 = vld [vmem:[%s3276_s15 + $0x24] sm:$0xf0] }
 0x31b   :  { %1528 = vmatpush.bf16.msra.mxu0 %v2224_v23  ;;  %v2024_v55 = vor.u32 %v2331_v52, %v2021_v53  ;;  %v2343_v23 = vld [vmem:[%s3276_s15 + $0x68] sm:$0xf0] }
 0x31c   :  { %1492 = vmatpush.bf16.msrb.mxu1 %v2044_v0  ;;  %v2111_v0 = vld [vmem:[%s3276_s15 + $0xb8] sm:$0xf]  ;;  %v2064_v26 = vor.u32 %v2343_v23, %v2063_v22 }
 0x31e   :  { %1506 = vmatpush.bf16.msrb.mxu3 %v2048_v1  ;;  %1518 = vmatpush.bf16.msra.mxu2 %v2108_v19  ;;  %v2356_v1 = vld [vmem:[%s3276_s15 + $0xd0] sm:$0xf0]  ;;  %v2342_v19 = vld [vmem:[%s3276_s15 + $0x60] sm:$0xf0] }
 0x31f   :  { %1529 = vmatpush.bf16.msra.mxu0 %v2196_v35  ;;  %v2112_v3 = vor.u32 %v2356_v1, %v2111_v0 }
 0x320   :  { %1493 = vmatpush.bf16.msrb.mxu1 %v2016_v13  ;;  %v2085_v13 = vld [vmem:[%s3276_s15 + $0x9c] sm:$0xf0] }
 0x322   :  { %1507 = vmatpush.bf16.msrb.mxu3 %v2020_v14  ;;  %1519 = vmatpush.bf16.msra.mxu2 %v2080_v31  ;;  %v2091_v14 = vld [vmem:[%s3276_s15 + $0x88] sm:$0xf]  ;;  %v2035_v31 = vld [vmem:[%s3276_s15 + $0x18] sm:$0xf] }
 0x323   :  { %v2036_v35 = vor.u32 %v2336_v32, %v2035_v31 }
 0x324   :  { %1542 = vmatpush.bf16.msra.mxu1 %v2228_v24  ;;  %v2056_v24 = vor.u32 %v2342_v19, %v2055_v18 }
 0x326   :  { %1556 = vmatpush.bf16.msra.mxu3 %v2232_v27  ;;  %1520 = vmatpush.bf16.msra.mxu2 %v2052_v43  ;;  %v2027_v27 = vld [vmem:[%s3276_s15 + $0x10] sm:$0xf] }
 0x327   :  { %v2028_v33 = vor.u32 %v2335_v28, %v2027_v27 }
 0x328   :  { %1543 = vmatpush.bf16.msra.mxu1 %v2200_v36 }
 0x32a   :  { %1557 = vmatpush.bf16.msra.mxu3 %v2204_v39  ;;  %1521 = vmatpush.bf16.msra.mxu2 %v2024_v55 }
 0x32c   :  { %1544 = vmatpush.bf16.msra.mxu1 %v2172_v48 }
 0x330   :  { %1545 = vmatpush.bf16.msra.mxu1 %v2144_v60 }
 0x39c   :  { %v1011_v47 = vpop.f32.mrf.mxu3 }
 0x39d   :  { %v1012_v63 = vadd.f32 %v2397_v51, %v1011_v47  ;;  %v2168_v47 = vor.u32 %v2370_v44, %v2167_v42  ;;  %v3247_v44 = vld [vmem:[%s3277_s16] sm:$0x7f]  ;;  %s1605_s16 = sshll.u32 %s2482_s14, 4  ;;  %s1606_s16 = int_to_ptr.vmem [resolvable:$true] %s1605_s16 }
 0x39e   :  { %v1170_v45 = vperm.slane %v3247_v44, 0  ;;  %v1171_v46 = vperm.slane %v3247_v44, 1  ;;  %v1173_v52 = vperm.slane %v3247_v44, 3  ;;  %v1174_v0 = vperm.slane %v3247_v44, 4 }
 0x39f   :  { %v1016_v11 = vmax.f32 %v1012_v63, 0.0  ;;  %1530 = vmatpush.bf16.msra.mxu0 %v2168_v47  ;;  %v2148_v63 = vor.u32 %v2364_v62, %v2147_v61  ;;  %v1175_v1 = vperm.slane %v3247_v44, 5 }
 0x3a3   :  { %1531 = vmatpush.bf16.msra.mxu0 %v2140_v59 }
 0x3a4   :  { %v1013_v4 = vpop.f32.mrf.mxu3 }
 0x3a5   :  { %v1014_v7 = vadd.f32 %v2397_v51, %v1013_v4  ;;  %v2176_v51 = vor.u32 %v2371_v50, %v2175_v49  ;;  %v2113_v4 = vld [vmem:[%s3276_s15 + $0xd4] sm:$0xf0] }
 0x3a7   :  { %v1017_v12 = vmax.f32 %v1014_v7, 0.0  ;;  %1558 = vmatpush.bf16.msra.mxu3 %v2176_v51  ;;  %v2116_v7 = vor.u32 %v2353_v2, %v2113_v4  ;;  %1532 = vmatpush.bf16.msra.mxu0 %v2112_v3  ;;  %v1172_v51 = vperm.slane %v3247_v44, 2 }
 0x3a9   :  { %v1018_v15 = vpack.c.bf16 %v1017_v12, %v1016_v11  ;;  %v2346_v11 = vld [vmem:[%s3276_s15 + $0x84] sm:$0xf]  ;;  %v2084_v12 = vor.u32 %v2349_v10, %v2083_v9  ;;  %1546 = vmatpush.bf16.msra.mxu1 %v2116_v7 }
 0x3aa   :  { %v2088_v16 = vor.u32 %v2346_v11, %v2085_v13 }
 0x3ab   :  { %1095 = vmatmul.bf16.vlgmr.msrb.gmra.mxu2 %v1018_v15  ;;  %1559 = vmatpush.bf16.msra.mxu3 %v2148_v63  ;;  %v2350_v15 = vld [vmem:[%s3276_s15 + $0xa0] sm:$0xf0] }
 0x3ac   :  { %v2092_v17 = vor.u32 %v2350_v15, %v2091_v14  ;;  %1533 = vmatpush.bf16.msra.mxu0 %v2084_v12 }
 0x3ad   :  { %1547 = vmatpush.bf16.msra.mxu1 %v2088_v16  ;;  %v1176_v16 = vperm.slane %v3247_v44, 6 }
 0x3af   :  { %1560 = vmatpush.bf16.msra.mxu3 %v2120_v8 }
 0x3b0   :  { %1534 = vmatpush.bf16.msra.mxu0 %v2056_v24 }
 0x3b1   :  { %1548 = vmatpush.bf16.msra.mxu1 %v2060_v25 }
 0x3b3   :  { %1561 = vmatpush.bf16.msra.mxu3 %v2092_v17 }
 0x3b4   :  { %1535 = vmatpush.bf16.msra.mxu0 %v2028_v33 }
 0x3b5   :  { %1549 = vmatpush.bf16.msra.mxu1 %v2032_v34 }
 0x3b7   :  { %1562 = vmatpush.bf16.msra.mxu3 %v2064_v26 }
 0x3bb   :  { %1563 = vmatpush.bf16.msra.mxu3 %v2036_v35 }
 0x42e   :  { %v1096_v36 = vpop.f32.mrf.mxu2 }
 0x42f   :  { %v1097_v38 = vadd.f32 %v2398_v37, %v1096_v36 }
 0x431   :  { %v1101_v41 = vmax.f32 %v1097_v38, 0.0 }
 0x436   :  { %v1098_v39 = vpop.f32.mrf.mxu2 }
 0x437   :  { %v1099_v40 = vadd.f32 %v2398_v37, %v1098_v39 }
 0x439   :  { %v1102_v42 = vmax.f32 %v1099_v40, 0.0 }
 0x43b   :  { %v1103_v43 = vpack.c.bf16 %v1102_v42, %v1101_v41 }
 0x43d   :  { %1480 = vmatmul.bf16.vlgmr.msrb.gmra.mxu0 %v1103_v43  ;;  %1494 = vmatmul.bf16.vlgmr.msrb.gmra.mxu1 %v1103_v43 }
 0x43e   :  { %1508 = vmatmul.bf16.vlgmr.msrb.gmra.mxu3 %v1103_v43  ;;  %1522 = vmatmul.bf16.vlgmr.msra.gmra.mxu2 %v1103_v43 }
 0x44d   :  { %1536 = vmatmul.bf16.vlgmr.msra.gmra.mxu0 %v1103_v43  ;;  %1550 = vmatmul.bf16.vlgmr.msra.gmra.mxu1 %v1103_v43 }
 0x44e   :  { %1564 = vmatmul.bf16.vlgmr.msra.gmra.mxu3 %v1103_v43 }
 0x4ba   :  { %v1481_v47 = vpop.f32.mrf.mxu0  ;;  %v1495_v48 = vpop.f32.mrf.mxu1 }
 0x4bb   :  { %v1482_v49 = vadd.f32 %v1481_v47, %v1170_v45  ;;  %v1496_v50 = vadd.f32 %v1495_v48, %v1171_v46 }
 0x4bd   :  { %2399 = vtanh.f32 %v1482_v49 }
 0x4be   :  { %2401 = vtanh.f32 %v1496_v50 }
 0x4c1   :  { %v1509_v53 = vpop.f32.mrf.mxu3  ;;  %v1523_v54 = vpop.f32.mrf.mxu2 }
 0x4c2   :  { %v1510_v55 = vadd.f32 %v1509_v53, %v1172_v51  ;;  %v1524_v56 = vadd.f32 %v1523_v54, %v1173_v52  ;;  %v1483_v57 = vpop.f32.mrf.mxu0  ;;  %v1497_v58 = vpop.f32.mrf.mxu1 }
 0x4c3   :  { %v2400_v59 = vpop.eup %2399  ;;  %v1484_v60 = vadd.f32 %v1483_v57, %v1170_v45  ;;  %v1498_v61 = vadd.f32 %v1497_v58, %v1171_v46 }
 0x4c4   :  { %v2402_v62 = vpop.eup %2401  ;;  %2403 = vtanh.f32 %v1510_v55 }
 0x4c5   :  { %v1584_v63 = vpack.c.bf16 %v2402_v62, %v2400_v59  ;;  %2405 = vtanh.f32 %v1524_v56 }
 0x4c6   :  { %2407 = vtanh.f32 %v1484_v60 }
 0x4c7   :  { %1592 = vst [vmem:[#allocation5] sm:$0xff] %v1584_v63  ;;  %2409 = vtanh.f32 %v1498_v61 }
 0x4c9   :  { %v1511_v2 = vpop.f32.mrf.mxu3  ;;  %v1525_v3 = vpop.f32.mrf.mxu2 }
 0x4ca   :  { %v2404_v4 = vpop.eup %2403  ;;  %v1512_v5 = vadd.f32 %v1511_v2, %v1172_v51  ;;  %v1526_v6 = vadd.f32 %v1525_v3, %v1173_v52  ;;  %v1537_v7 = vpop.f32.mrf.mxu0 }
 0x4cb   :  { %v1551_v8 = vpop.f32.mrf.mxu1  ;;  %v2406_v9 = vpop.eup %2405  ;;  %v1538_v10 = vadd.f32 %v1537_v7, %v1174_v0 }
 0x4cc   :  { %v1552_v11 = vadd.f32 %v1551_v8, %v1175_v1  ;;  %v2408_v12 = vpop.eup %2407  ;;  %v1585_v13 = vpack.c.bf16 %v2406_v9, %v2404_v4  ;;  %2411 = vtanh.f32 %v1512_v5 }
 0x4cd   :  { %v2410_v14 = vpop.eup %2409  ;;  %2413 = vtanh.f32 %v1526_v6 }
 0x4ce   :  { %1593 = vst [vmem:[#allocation5 + $0x8] sm:$0xff] %v1585_v13  ;;  %v1588_v15 = vpack.c.bf16 %v2410_v14, %v2408_v12  ;;  %2415 = vtanh.f32 %v1538_v10 }
 0x4cf   :  { %2417 = vtanh.f32 %v1552_v11 }
 0x4d0   :  { %1597 = vst [vmem:[#allocation5 + $0x1c] sm:$0xff] %v1588_v15 }
 0x4d1   :  { %v1565_v17 = vpop.f32.mrf.mxu3 }
 0x4d2   :  { %v2412_v18 = vpop.eup %2411  ;;  %v1566_v19 = vadd.f32 %v1565_v17, %v1176_v16  ;;  %v1539_v20 = vpop.f32.mrf.mxu0 }
 0x4d3   :  { %v1553_v21 = vpop.f32.mrf.mxu1  ;;  %v2414_v22 = vpop.eup %2413  ;;  %v1540_v23 = vadd.f32 %v1539_v20, %v1174_v0 }
 0x4d4   :  { %v1554_v24 = vadd.f32 %v1553_v21, %v1175_v1  ;;  %v2416_v25 = vpop.eup %2415  ;;  %v1589_v26 = vpack.c.bf16 %v2414_v22, %v2412_v18  ;;  %2419 = vtanh.f32 %v1566_v19 }
 0x4d5   :  { %v2418_v27 = vpop.eup %2417  ;;  %2421 = vtanh.f32 %v1540_v23 }
 0x4d6   :  { %1598 = vst [vmem:[#allocation5 + $0x24] sm:$0xff] %v1589_v26  ;;  %v1586_v28 = vpack.c.bf16 %v2418_v27, %v2416_v25  ;;  %2423 = vtanh.f32 %v1554_v24 }
 0x4d8   :  { %1594 = vst [vmem:[#allocation5 + $0x10] sm:$0xff] %v1586_v28 }
 0x4d9   :  { %v1567_v29 = vpop.f32.mrf.mxu3 }
 0x4da   :  { %v2420_v30 = vpop.eup %2419  ;;  %v1568_v31 = vadd.f32 %v1567_v29, %v1176_v16 }
 0x4db   :  { %v2422_v32 = vpop.eup %2421  ;;  %v1587_v33 = vpack.c.bf16 %v2420_v30, %v2420_v30 }
 0x4dc   :  { %v2424_v34 = vpop.eup %2423  ;;  %2425 = vtanh.f32 %v1568_v31 }
 0x4dd   :  { %1596 = vst.msk [vmem:[#allocation5 + $0x18] sm:$0xf] %vm1595_vm1, %v1587_v33  ;;  %v1590_v35 = vpack.c.bf16 %v2424_v34, %v2422_v32 }
 0x4df   :  { %1599 = vst [vmem:[#allocation5 + $0x2c] sm:$0xff] %v1590_v35 }
 0x4e2   :  { %v2426_v36 = vpop.eup %2425 }
 0x4e3   :  { %v1591_v37 = vpack.c.bf16 %v2426_v36, %v2426_v36 }
 0x4e5   :  { %1600 = vst.msk [vmem:[#allocation5 + $0x34] sm:$0xf] %vm1595_vm1, %v1591_v37 }
 0x4e6   :  { %1613 = dma.vmem_to_hbm [thread:$0]  %s1606_s16, 896, %s1608_s12, [#allocation4], %s2483_s30, %s2483_s30, %s2484_s7  }
 0x4e7   :  { %2477 = dma.done.wait [#allocation4], 896  }
 0x4e8   :  { %2478 = vsyncadd [#allocation4], 4294966400 }
 0x4e9   :  { %1618 = vsyncpa [#allocation3], 1 }
 0x4ea   :  { %1619 = vsyncpa [#allocation4], 1 }

</bundles_post_ra>
